<compile_context>
chip_gen: v6e
topology: v6e:2x2x1
jax: 0.10.0
libtpu: 0.0.40
codegen_flags: <defaults>
</compile_context>

<pallas_src>
import functools

import jax
import jax.numpy as jnp
from jax.experimental import pallas as pl
from jax.experimental.pallas import tpu as pltpu

LANE = 128  # TPU lane width; all feature dims are padded to a multiple of this.


def _round_up(x, m):
    return ((x + m - 1) // m) * m


def _pad2(a, rows, cols):
    return jnp.pad(a, ((0, rows - a.shape[0]), (0, cols - a.shape[1])))


# ----------------------------------------------------------------------------
# Fused multi-layer kernel: grid over layers, A_hat + activations VMEM-resident
# ----------------------------------------------------------------------------
def _fused_kernel(a_ref, x_ref, w_ref, b_ref, o_ref, h_ref):
    layer = pl.program_id(0)

    @pl.when(layer == 0)
    def _():
        h_ref[...] = x_ref[...]  # activations live in VMEM scratch across layers

    # X @ W  (small matmul, f32)
    xw = jnp.dot(h_ref[...], w_ref[0], preferred_element_type=jnp.float32)
    # A_hat @ (XW) in bf16 on the MXU with f32 accumulation, + bias
    agg = jnp.dot(a_ref[...], xw.astype(jnp.bfloat16),
                  preferred_element_type=jnp.float32) + b_ref[0]

    is_last = layer == pl.num_programs(0) - 1
    h_new = jnp.where(is_last, agg, jnp.maximum(agg, 0.0))  # ReLU except last
    h_ref[...] = h_new

    @pl.when(is_last)
    def _():
        o_ref[...] = h_new


def _fused_forward(a_pad, x_pad, w_stack, b_stack):
    n_pad, d_pad = x_pad.shape
    num_layers = int(w_stack.shape[0])
    flops = num_layers * (2 * n_pad * d_pad * d_pad + 2 * n_pad * n_pad * d_pad)
    bytes_acc = (a_pad.size * 2 + (x_pad.size + n_pad * d_pad) * 4
                 + w_stack.size * 4 + b_stack.size * 4)
    return pl.pallas_call(
        _fused_kernel,
        out_shape=jax.ShapeDtypeStruct((n_pad, d_pad), jnp.float32),
        grid_spec=pltpu.PrefetchScalarGridSpec(
            num_scalar_prefetch=0,
            grid=(num_layers,),
            in_specs=[
                pl.BlockSpec((n_pad, n_pad), lambda l: (0, 0)),      # A_hat (bf16)
                pl.BlockSpec((n_pad, d_pad), lambda l: (0, 0)),      # X (f32)
                pl.BlockSpec((1, d_pad, d_pad), lambda l: (l, 0, 0)),  # W_l
                pl.BlockSpec((1, 1, d_pad), lambda l: (l, 0, 0)),      # b_l
            ],
            out_specs=pl.BlockSpec((n_pad, d_pad), lambda l: (0, 0)),
            scratch_shapes=[pltpu.VMEM((n_pad, d_pad), jnp.float32)],
        ),
        compiler_params=pltpu.CompilerParams(
            dimension_semantics=("arbitrary",)),  # layer loop is sequential
        cost_estimate=pl.CostEstimate(flops=flops, transcendentals=0,
                                      bytes_accessed=bytes_acc),
    )(a_pad, x_pad, w_stack, b_stack)


# ----------------------------------------------------------------------------
# Tiled per-layer fallback for graphs whose A_hat does not fit in VMEM
# ----------------------------------------------------------------------------
def _xw_kernel(x_ref, w_ref, o_ref):
    o_ref[...] = jnp.dot(x_ref[...], w_ref[...],
                         preferred_element_type=jnp.float32).astype(o_ref.dtype)


def _agg_kernel(a_ref, h_ref, b_ref, o_ref, acc_ref, *, activation):
    @pl.when(pl.program_id(1) == 0)
    def _():
        acc_ref[...] = jnp.zeros_like(acc_ref)

    acc_ref[...] += jnp.dot(a_ref[...], h_ref[...],
                            preferred_element_type=jnp.float32)

    @pl.when(pl.program_id(1) == pl.num_programs(1) - 1)
    def _():
        out = acc_ref[...] + b_ref[...]          # fused epilogue: bias (+ReLU)
        if activation:
            out = jnp.maximum(out, 0.0)
        o_ref[...] = out


def _tiled_layer(a_pad, h, w, b, *, activation, tile):
    n_pad, d_pad = h.shape

    # 1) H = X @ W, computed once (not per row-tile), bf16 output for the
    #    aggregation operand.
    xw = pl.pallas_call(
        _xw_kernel,
        out_shape=jax.ShapeDtypeStruct((n_pad, d_pad), jnp.bfloat16),
        grid_spec=pltpu.PrefetchScalarGridSpec(
            num_scalar_prefetch=0,
            grid=(n_pad // tile,),
            in_specs=[
                pl.BlockSpec((tile, d_pad), lambda i: (i, 0)),
                pl.BlockSpec((d_pad, d_pad), lambda i: (0, 0)),
            ],
            out_specs=pl.BlockSpec((tile, d_pad), lambda i: (i, 0)),
        ),
        compiler_params=pltpu.CompilerParams(dimension_semantics=("parallel",)),
    )(h, w)

    # 2) out = A_hat @ H + b (+ReLU): grid over (row-tiles, contraction-tiles),
    #    f32 accumulator in VMEM, rows parallel (megacore), reduction last.
    flops = 2 * n_pad * n_pad * d_pad
    bytes_acc = a_pad.size * 2 + xw.size * 2 + n_pad * d_pad * 4
    return pl.pallas_call(
        functools.partial(_agg_kernel, activation=activation),
        out_shape=jax.ShapeDtypeStruct((n_pad, d_pad), jnp.float32),
        grid_spec=pltpu.PrefetchScalarGridSpec(
            num_scalar_prefetch=0,
            grid=(n_pad // tile, n_pad // tile),
            in_specs=[
                pl.BlockSpec((tile, tile), lambda i, k: (i, k)),   # A_hat tile
                pl.BlockSpec((tile, d_pad), lambda i, k: (k, 0)),  # H tile
                pl.BlockSpec((1, d_pad), lambda i, k: (0, 0)),     # bias row
            ],
            out_specs=pl.BlockSpec((tile, d_pad), lambda i, k: (i, 0)),
            scratch_shapes=[pltpu.VMEM((tile, d_pad), jnp.float32)],
        ),
        compiler_params=pltpu.CompilerParams(
            dimension_semantics=("parallel", "arbitrary")),
        cost_estimate=pl.CostEstimate(flops=flops, transcendentals=0,
                                      bytes_accessed=bytes_acc),
    )(a_pad, xw, b)


# ----------------------------------------------------------------------------
# Plain-JAX glue: normalized adjacency, params, forward dispatch
# ----------------------------------------------------------------------------
def build_normalized_adjacency(edge_index, num_nodes):
    """D^-1/2 (A + I) D^-1/2 as a dense (N, N) f32 matrix (binary A, dedup'd)."""
    src, dst = edge_index[0], edge_index[1]
    adj = jnp.zeros((num_nodes, num_nodes), jnp.float32)
    adj = adj.at[dst, src].set(1.0)  # message src -> dst; duplicates collapse to 1
    # Self loops without double-counting edges that already are self loops.
    adj = jnp.maximum(adj, jnp.eye(num_nodes, dtype=jnp.float32))
    deg = jnp.sum(adj, axis=1)       # >= 1 thanks to the self loop
    d_inv_sqrt = jax.lax.rsqrt(deg)
    return adj * d_inv_sqrt[:, None] * d_inv_sqrt[None, :]


def init_gcn_params(key, in_dim, hidden_dim, out_dim, num_layers):
    """Glorot-uniform weights + zero bias for each layer, deterministic."""
    dims = [in_dim] + [hidden_dim] * (num_layers - 1) + [out_dim]
    params = []
    for i in range(num_layers):
        key, wkey = jax.random.split(key)
        d_in, d_out = dims[i], dims[i + 1]
        limit = jnp.sqrt(6.0 / (d_in + d_out))
        w = jax.random.uniform(wkey, (d_in, d_out), jnp.float32, -limit, limit)
        b = jnp.zeros((1, d_out), jnp.float32)
        params.append((w, b))
    return params


def gcn_net_forward(x, edge_index, params, *, force_tiled=False, tile=512,
                    fused_max_nodes=2048):
    """GCNNet forward: conv1(ReLU) -> hidden convs(ReLU) -> convf(no act)."""
    n, in_dim = x.shape
    out_dim = params[-1][0].shape[1]
    num_layers = len(params)

    a_hat = build_normalized_adjacency(edge_index, n)

    # Pad every feature dim to a common lane-dense width (multiple of 128).
    d_pad = _round_up(max([in_dim, out_dim] + [w.shape[1] for w, _ in params]),
                      LANE)
    # Fused (A_hat resident) path while it comfortably fits the 32 MiB scoped
    # VMEM default on every chip generation (incl. v7x's 64 MiB physical VMEM);
    # beyond that, stream A_hat through the tiled path.
    use_fused = (not force_tiled) and (_round_up(n, LANE) <= fused_max_nodes)
    n_pad = _round_up(n, LANE if use_fused else tile)

    a_pad = _pad2(a_hat, n_pad, n_pad).astype(jnp.bfloat16)
    x_pad = _pad2(x, n_pad, d_pad)
    w_stack = jnp.stack([_pad2(w, d_pad, d_pad) for w, _ in params])
    b_stack = jnp.stack([_pad2(b, 1, d_pad) for _, b in params])

    if use_fused:
        out = _fused_forward(a_pad, x_pad, w_stack, b_stack)
    else:
        h = x_pad
        for l in range(num_layers):
            h = _tiled_layer(a_pad, h, w_stack[l], b_stack[l],
                             activation=(l < num_layers - 1), tile=tile)
        out = h
    return out[:n, :out_dim]


def gcn_reference(x, edge_index, params):
    """Pure-JAX f32 reference of the same forward."""
    a_hat = build_normalized_adjacency(edge_index, x.shape[0])
    h = x
    for i, (w, b) in enumerate(params):
        h = a_hat @ (h @ w) + b
        if i < len(params) - 1:
            h = jnp.maximum(h, 0.0)
    return h


# ----------------------------------------------------------------------------
# Demo
# ----------------------------------------------------------------------------
if __name__ == "__main__":
    key = jax.random.PRNGKey(0)
    k_x, k_e, k_p = jax.random.split(key, 3)

    num_nodes = 200
    in_dim, hidden_dim, out_dim, num_layers = 16, 32, 8, 3
    num_edges = 800

    x = jax.random.normal(k_x, (num_nodes, in_dim), jnp.float32)
    edge_index = jax.random.randint(k_e, (2, num_edges), 0, num_nodes, jnp.int32)
    params = init_gcn_params(k_p, in_dim, hidden_dim, out_dim, num_layers)

    ref = gcn_reference(x, edge_index, params)

    # Fused (VMEM-resident A_hat) path.
    out_fused = jax.block_until_ready(gcn_net_forward(x, edge_index, params))
    assert out_fused.shape == (num_nodes, out_dim), out_fused.shape
    assert bool(jnp.all(jnp.isfinite(out_fused)))
    err_fused = float(jnp.max(jnp.abs(out_fused - ref)))
    assert err_fused < 5e-2, f"fused path error too large: {err_fused}"

    # Tiled fallback path (exercised here at small tiles for validation).
    out_tiled = jax.block_until_ready(
        gcn_net_forward(x, edge_index, params, force_tiled=True, tile=128))
    assert out_tiled.shape == (num_nodes, out_dim), out_tiled.shape
    assert bool(jnp.all(jnp.isfinite(out_tiled)))
    err_tiled = float(jnp.max(jnp.abs(out_tiled - ref)))
    assert err_tiled < 5e-2, f"tiled path error too large: {err_tiled}"

    print("KERNEL_OK")
</pallas_src>

<mosaic_0001>
module attributes {stable_mosaic.version = 11 : i64} {
  func.func @_fused_kernel(%arg0: i32, %arg1: memref<256x256xbf16, #tpu.memory_space<vmem>>, %arg2: memref<256x128xf32, #tpu.memory_space<vmem>>, %arg3: memref<1x128x128xf32, #tpu.memory_space<vmem>>, %arg4: memref<1x1x128xf32, #tpu.memory_space<vmem>>, %arg5: memref<256x128xf32, #tpu.memory_space<vmem>>, %arg6: memref<256x128xf32, #tpu.memory_space<vmem>>) attributes {dimension_semantics = [#tpu.dimension_semantics<arbitrary>], iteration_bounds = array<i64: 3>, scalar_prefetch = 0 : i64, scratch_operands = 1 : i64, tpu.core_type = #tpu.core_type<tc>, window_params = [{pipeline_mode = #tpu.pipeline_mode<synchronous>, transform_indices = @transform_0, window_bounds = array<i64: 256, 256>}, {pipeline_mode = #tpu.pipeline_mode<synchronous>, transform_indices = @transform_1, window_bounds = array<i64: 256, 128>}, {transform_indices = @transform_2, window_bounds = array<i64: 1, 128, 128>}, {transform_indices = @transform_3, window_bounds = array<i64: 1, 1, 128>}, {pipeline_mode = #tpu.pipeline_mode<synchronous>, transform_indices = @transform_4, window_bounds = array<i64: 256, 128>}]} {
    %c0_i32 = arith.constant 0 : i32
    %0 = arith.cmpi eq, %arg0, %c0_i32 : i32
    %1 = arith.extui %0 : i1 to i32
    %c0_i32_0 = arith.constant 0 : i32
    %2 = arith.cmpi ne, %1, %c0_i32_0 : i32
    scf.if %2 {
      %c0_15 = arith.constant 0 : index
      %c0_16 = arith.constant 0 : index
      %21 = vector.load %arg2[%c0_15, %c0_16] : memref<256x128xf32, #tpu.memory_space<vmem>>, vector<256x128xf32>
      %c0_17 = arith.constant 0 : index
      %c0_18 = arith.constant 0 : index
      %22 = vector.load %arg6[%c0_17, %c0_18] : memref<256x128xf32, #tpu.memory_space<vmem>>, vector<256x128xf32>
      tpu.vector_store %arg6[%c0_17, %c0_18], %21 {strides = array<i32>} : memref<256x128xf32, #tpu.memory_space<vmem>>, vector<256x128xf32>,
    } else {
    }
    %c0 = arith.constant 0 : index
    %c0_1 = arith.constant 0 : index
    %3 = vector.load %arg6[%c0, %c0_1] : memref<256x128xf32, #tpu.memory_space<vmem>>, vector<256x128xf32>
    %c0_2 = arith.constant 0 : index
    %c0_3 = arith.constant 0 : index
    %c0_4 = arith.constant 0 : index
    %4 = vector.load %arg3[%c0_2, %c0_3, %c0_4] : memref<1x128x128xf32, #tpu.memory_space<vmem>>, vector<1x128x128xf32>
    %5 = vector.shape_cast %4 : vector<1x128x128xf32> to vector<128x128xf32>
    %cst = arith.constant dense<0.000000e+00> : vector<256x128xf32>
    %6 = tpu.matmul %3, %5, %cst {dimension_numbers = #tpu.dot_dimension_numbers<[1], [0], [0], [1], [0, 0, 1, 1], [], []>} : vector<256x128xf32>, vector<128x128xf32>, vector<256x128xf32> -> vector<256x128xf32>
    %c0_5 = arith.constant 0 : index
    %c0_6 = arith.constant 0 : index
    %7 = vector.load %arg1[%c0_5, %c0_6] : memref<256x256xbf16, #tpu.memory_space<vmem>>, vector<256x256xbf16>
    %8 = arith.truncf %6 : vector<256x128xf32> to vector<256x128xbf16>
    %cst_7 = arith.constant dense<0.000000e+00> : vector<256x128xf32>
    %9 = tpu.matmul %7, %8, %cst_7 {dimension_numbers = #tpu.dot_dimension_numbers<[1], [0], [0], [1], [0, 0, 1, 1], [], []>} : vector<256x256xbf16>, vector<256x128xbf16>, vector<256x128xf32> -> vector<256x128xf32>
    %c0_8 = arith.constant 0 : index
    %c0_9 = arith.constant 0 : index
    %c0_10 = arith.constant 0 : index
    %10 = vector.load %arg4[%c0_8, %c0_9, %c0_10] : memref<1x1x128xf32, #tpu.memory_space<vmem>>, vector<1x1x128xf32>
    %11 = vector.shape_cast %10 : vector<1x1x128xf32> to vector<1x128xf32>
    %12 = vector.broadcast %11 : vector<1x128xf32> to vector<256x128xf32>
    %13 = arith.addf %9, %12 : vector<256x128xf32>
    %c2_i32 = arith.constant 2 : i32
    %14 = arith.cmpi eq, %arg0, %c2_i32 : i32
    %cst_11 = arith.constant 0.000000e+00 : f32
    %15 = vector.broadcast %cst_11 : f32 to vector<256x128xf32>
    %16 = arith.maximumf %13, %15 : vector<256x128xf32>
    %17 = arith.select %14, %13, %16 : vector<256x128xf32>
    %c0_12 = arith.constant 0 : index
    %c0_13 = arith.constant 0 : index
    %18 = vector.load %arg6[%c0_12, %c0_13] : memref<256x128xf32, #tpu.memory_space<vmem>>, vector<256x128xf32>
    tpu.vector_store %arg6[%c0_12, %c0_13], %17 {strides = array<i32>} : memref<256x128xf32, #tpu.memory_space<vmem>>, vector<256x128xf32>,
    %19 = arith.extui %14 : i1 to i32
    %c0_i32_14 = arith.constant 0 : i32
    %20 = arith.cmpi ne, %19, %c0_i32_14 : i32
    scf.if %20 {
      %c0_15 = arith.constant 0 : index
      %c0_16 = arith.constant 0 : index
      %21 = vector.load %arg5[%c0_15, %c0_16] : memref<256x128xf32, #tpu.memory_space<vmem>>, vector<256x128xf32>
      tpu.vector_store %arg5[%c0_15, %c0_16], %17 {strides = array<i32>} : memref<256x128xf32, #tpu.memory_space<vmem>>, vector<256x128xf32>,
    } else {
    }
    return
  }
  func.func @transform_0(%arg0: i32) -> (i32, i32) {
    %c0_i32 = arith.constant 0 : i32
    %c0_i32_0 = arith.constant 0 : i32
    %c0_i32_1 = arith.constant 0 : i32
    return %c0_i32, %c0_i32_0 : i32, i32
  }
  func.func @transform_1(%arg0: i32) -> (i32, i32) {
    %c0_i32 = arith.constant 0 : i32
    %c0_i32_0 = arith.constant 0 : i32
    %c0_i32_1 = arith.constant 0 : i32
    return %c0_i32, %c0_i32_0 : i32, i32
  }
  func.func @transform_2(%arg0: i32) -> (i32, i32, i32) {
    %c0_i32 = arith.constant 0 : i32
    %c0_i32_0 = arith.constant 0 : i32
    %c0_i32_1 = arith.constant 0 : i32
    return %arg0, %c0_i32, %c0_i32_0 : i32, i32, i32
  }
  func.func @transform_3(%arg0: i32) -> (i32, i32, i32) {
    %c0_i32 = arith.constant 0 : i32
    %c0_i32_0 = arith.constant 0 : i32
    %c0_i32_1 = arith.constant 0 : i32
    return %arg0, %c0_i32, %c0_i32_0 : i32, i32, i32
  }
  func.func @transform_4(%arg0: i32) -> (i32, i32) {
    %c0_i32 = arith.constant 0 : i32
    %c0_i32_0 = arith.constant 0 : i32
    %c0_i32_1 = arith.constant 0 : i32
    return %c0_i32, %c0_i32_0 : i32, i32
  }
}

</mosaic_0001>

<bundles_post_ra>
// kernel: tpu_custom_call.1
= control target key start
LH: loop header
LB: loop body
LE: loop exit
PB: predicated region body
PF: predicated region fallthrough
CT: control target
= control target key end

     0   :  { %9 = vsyncpa [#allocation4], 0  ;;  %s2217_s0 = inlined_call_operand.hbm [shape: bf16[256,256], index: 0, kind: input, shape index: {}]   ;;  %s2218_s1 = inlined_call_operand.hbm [shape: f32[256,128], index: 1, kind: input, shape index: {}]   ;;  %s2219_s2 = inlined_call_operand.hbm [shape: f32[3,128,128], index: 2, kind: input, shape index: {}]   ;;  %s2220_s3 = inlined_call_operand.vmem [shape: f32[3,1,128], index: 3, kind: input, shape index: {}]   ;;  %s2221_s4 = inlined_call_operand.hbm [shape: f32[256,128], index: 4, kind: output, shape index: {}]  }
   0x1   :  { %10 = vsyncpa [#allocation7], 0 }
   0x2   :  { %11 = vsyncpa [#allocation5], 0  ;;  %s1797_s15 = smov 0   ;;  %s1799_s16 = smov 0  }
   0x3   :  { %s1801_s17 = smov 0   ;;  %s1803_s18 = smov 0  }
   0x4 LB: > { %s1816_s19 = sadd.s32 4294967295, %s1762_s18   ;;  %s1819_s20 = sadd.s32 1, %s1762_s18   ;;  %s1762_s18 = sphi %s1803_s18, %s2242_s18   ;;  %s1758_s17 = sphi %s1801_s17, %s2241_s17   ;;  %s1754_s16 = sphi %s1799_s16, %s2240_s16   ;;  %s1750_s15 = sphi %s1797_s15, %s2239_s15  }
   0x5   : > { %s63_s21 = ssub.s32 %s1762_s18, %s1819_s20  ;;  %s66_s22 = sadd.s32 1, %s1758_s17 }
   0x6   : > { %p64_p0 = scmp.eq.s32.totalorder %s63_s21, 0  ;;  %p73_p1 = scmp.ne.s32.totalorder %s1758_s17, %s1754_s16 }
   0x7   : > { %p74_p2 = scmp.eq.s32.totalorder %s1762_s18, 0  ;;  %p79_p3 = scmp.ne.s32.totalorder %s1754_s16, %s1750_s15 }
   0x8   : > { %s1829_s23 = scalar_select %p64_p0, %s1758_s17, %s66_s22  }
   0x9   : > { %p1831_p4 = por %p74_p2, %p73_p1  ;;  %p2222_p5 = scmp.eq.s32.totalorder %s1816_s19, 0 }
   0xa   : > { %p1186_p6 = scmp.ge.s32.totalorder %s1762_s18, 1  ;;  %p137_p7 = scmp.lt.s32.totalorder %s1762_s18, 4 }
   0xb   : > { %p1840_p8 = por %p2222_p5, %p79_p3  ;;  %s1764_s27 = smov [#allocation3]  }
   0xc   : > { %p1845_p10 = pnand %p1186_p6, %p137_p7  ;;  %s149_s28 = sshll.u32 %s1764_s27, 4  ;;  %s150_s28 = int_to_ptr.vmem [resolvable:$true] %s149_s28 }
   0xd   : > { %s2226_s25 = scalar_select %p1840_p8, 1, 0 }
   0xe   : > { %s2227_s26 = scalar_select %p1845_p10, 1, 0 }
   0xf   : > { %p1507_p11 = pneg %p1845_p10  ;;  %p1520_p13 = scmp.lt.s32.totalorder %s1762_s18, 3 }
  0x10   : > { %s1623_s5 = scalar_lea.vmem %s150_s28, 4096  ;;  %p1631_p7 = scmp.lt.s32.totalorder %s150_s28, %s150_s28 }
  0x11   : > { %p1853_p12 = pnand %p1507_p11, %p2222_p5  ;;  %p1860_p0 = pnand %p1520_p13, %p1831_p4 }
  0x12   : > { %p1624_p2 = scmp.ne.s32.totalorder %s150_s28, %s1623_s5  ;;  %p1632_p11 = scmp.lt.s32.totalorder %s1623_s5, %s1623_s5 }
  0x13   : > { %p1614_p1 = pneg %p1853_p12 }
  0x14   : > { %p1633_p9 = por %p1632_p11, %p1631_p7 }
  0x15   : > { %p1626_p3 = pnand %p1624_p2, %p1614_p1 }
  0x17   : > { %p1627_p6 = pneg %p1626_p3 }
  0x19   : > { %p1634_p5 = pnand %p1633_p9, %p1627_p6 }
  0x1b   : > { %1637 = shalt.err (!%p1634_p5)
}
  0x1c   : > { %s1765_s6 = smov 128   ;;  %s1766_s7 = smov 8  }
  0x1d   : > { %1510 = dma.hbm_to_vmem [thread:$0]  (!%p1853_p12), %s2217_s0, 4096, %s150_s28, [#allocation4], %s1765_s6, %s1765_s6, %s1766_s7  }
  0x1e   : > { %s1767_s10 = smov [#allocation6]   ;;  %s176_s12 = sand.u32 1, %s1762_s18  }
  0x1f   : > { %s162_s11 = sshll.u32 %s1767_s10, 4  ;;  %s163_s11 = int_to_ptr.vmem [resolvable:$true] %s162_s11 }
  0x20   : > { %s1649_s13 = scalar_lea.vmem %s163_s11, 4096  ;;  %p1657_p13 = scmp.lt.s32.totalorder %s163_s11, %s163_s11 }
  0x21   : > { %p1650_p4 = scmp.ne.s32.totalorder %s163_s11, %s1649_s13  ;;  %p1658_p2 = scmp.lt.s32.totalorder %s1649_s13, %s1649_s13 }
  0x23   : > { %p1652_p5 = pnand %p1650_p4, %p1614_p1  ;;  %p1659_p3 = por %p1658_p2, %p1657_p13 }
  0x25   : > { %p1653_p9 = pneg %p1652_p5 }
  0x27   : > { %p1660_p6 = pnand %p1659_p3, %p1653_p9 }
  0x29   : > { %1663 = shalt.err (!%p1660_p6)
}
  0x2a   : > { %1513 = dma.hbm_to_vmem [thread:$0]  (!%p1853_p12), %s2218_s1, 4096, %s163_s11, [#allocation7], %s1765_s6, %s1765_s6, %s1766_s7  }
  0x2b   : > { %s178_s21 = sand.u32 1, %s1758_s17   ;;  %s1236_s22 = sshll.u32 %s1762_s18, 11 }
  0x2c   : > { %s1190_s24 = sshll.u32 %s178_s21, 7  ;;  %s1894_s5 = scalar_lea.hbm %s2219_s2, %s1236_s22 }
  0x2d   : > { %s180_s29 = scalar_lea.vmem [#allocation8], %s1190_s24  ;;  %s1898_s9 = scalar_lea.sflag [#allocation4], %s176_s12 }
  0x2e   : > { %s187_s8 = sshll.u32 %s180_s29, 4  ;;  %s1664_s10 = scalar_lea.hbm %s1894_s5, 2048  ;;  %s1896_s8 = int_to_ptr.vmem [resolvable:$true] %s187_s8 }
  0x2f   : > { %p1665_p1 = scmp.ne.s32.totalorder %s1894_s5, %s1664_s10  ;;  %p1666_p12 = pneg %p1860_p0 }
  0x30   : > { %s1669_s13 = scalar_lea.hbm %s2219_s2, 6144  ;;  %p1670_p4 = scmp.lt.s32.totalorder %s1894_s5, %s2219_s2 }
  0x31   : > { %p1667_p7 = pnand %p1666_p12, %p1665_p1  ;;  %p1671_p5 = scmp.lt.s32.totalorder %s1669_s13, %s1664_s10 }
  0x33   : > { %p1668_p11 = pneg %p1667_p7  ;;  %p1672_p9 = por %p1671_p5, %p1670_p4 }
  0x35   : > { %p1673_p13 = pnand %p1672_p9, %p1668_p11 }
  0x37   : > { %1676 = shalt.err (!%p1673_p13)
}
  0x38   : > { %s1677_s12 = scalar_lea.vmem %s1896_s8, 2048  ;;  %s1768_s21 = smov [#allocation8]  }
  0x39   : > { %p1678_p2 = scmp.ne.s32.totalorder %s1896_s8, %s1677_s12  ;;  %s1682_s22 = sshll.u32 %s1768_s21, 4  ;;  %s1683_s22 = int_to_ptr.vmem [resolvable:$false] %s1682_s22 }
  0x3a   : > { %s1684_s24 = scalar_lea.vmem %s1683_s22, 4096  ;;  %p1685_p1 = scmp.lt.s32.totalorder %s1896_s8, %s1683_s22 }
  0x3b   : > { %p1680_p3 = pnand %p1678_p2, %p1666_p12  ;;  %p1686_p7 = scmp.lt.s32.totalorder %s1684_s24, %s1677_s12 }
  0x3d   : > { %p1681_p6 = pneg %p1680_p3  ;;  %p1687_p8 = por %p1686_p7, %p1685_p1 }
  0x3f   : > { %p1688_p10 = pnand %p1687_p8, %p1681_p6 }
  0x41   : > { %1691 = shalt.err (!%p1688_p10)
}
  0x42   : > { %1517 = dma.hbm_to_vmem [thread:$0]  (!%p1860_p0), %s1894_s5, 2048, %s1896_s8, %s1898_s9, %s1765_s6, %s1765_s6, %s1766_s7  }
  0x43   : > { %p2230_p12 = scmp.ne.s32.totalorder %s2227_s26, 0 }
  0x44   : > { %p2231_p11 = scmp.eq.s32.totalorder (!%p2230_p12), %s1816_s19, 0 }
  0x45   : > { %205 = sbr.rel (%p2230_p12) target bundleno = 758 (0x2f6), region = 36 }
  0x4a   : > { %1733 = dma.done.wait (%p2231_p11), [#allocation4], 4096   ;;  %p2232_p4 = pmov %p2231_p11 }
  0x4c   : > { %1735 = vsyncadd (%p2232_p4), [#allocation4], 4294963200  ;;  %p2233_p8 = pmov %p2232_p4 }
  0x4d   : > { %p2234_p10 = pmov %p2232_p4 }
  0x4e   : > { %1737 = dma.done.wait (%p2233_p8), [#allocation7], 4096  }
  0x4f   : > { %1739 = vsyncadd (%p2234_p10), [#allocation7], 4294963200  ;;  %s215_s30 = sand.u32 1, %s1816_s19   ;;  %s217_s6 = sand.u32 1, %s1754_s16  }
  0x50   : > { %s1196_s7 = sshll.u32 %s217_s6, 7  ;;  %s216_s26 = scalar_lea.sflag [#allocation4], %s215_s30 }
  0x51   : > { %s1934_s27 = scalar_lea.vmem [#allocation8], %s1196_s7  ;;  %p2235_p0 = scmp.ne.s32.totalorder %s2226_s25, 0 }
  0x53   : > { %1741 = dma.done.wait (%p2235_p0), %s216_s26, 2048  }
  0x54   : > { %1743 = vsyncadd (%p2235_p0), %s216_s26, 4294965248  ;;  %p242_p5 = scmp.lt.s32.totalorder %s1816_s19, 2  ;;  %p2236_p9 = scmp.ne.s32.totalorder %s1816_s19, 0 }
  0x56   : > { %s1942_s28 = scalar_select %p242_p5, %s1816_s19, 2 }
  0x57   : > { %249 = sbr.rel (%p2236_p9) target bundleno = 109 (0x6d), region = 52 }
  0x58   : > { %s244_s8 = scalar_lea.vmem %s2220_s3, %s1942_s28 }
  0x5c   : > { %v250_v0 = vld [vmem:[#allocation6] sm:$0xff]  ;;  %v251_v1 = vld [vmem:[#allocation6 + $0x8] sm:$0xff]  ;;  %v252_v2 = vld [vmem:[#allocation6 + $0x10] sm:$0xff] }
  0x5d   : > { %282 = vst [vmem:[#allocation2 + $0xb0] sm:$0xff] %v250_v0  ;;  %283 = vst [vmem:[#allocation2] sm:$0xff] %v251_v1  ;;  %v253_v3 = vld [vmem:[#allocation6 + $0x18] sm:$0xff]  ;;  %v254_v4 = vld [vmem:[#allocation6 + $0x20] sm:$0xff] }
  0x5e   : > { %284 = vst [vmem:[#allocation2 + $0xd8] sm:$0xff] %v252_v2  ;;  %v255_v5 = vld [vmem:[#allocation6 + $0x28] sm:$0xff]  ;;  %285 = vst [vmem:[#allocation2 + $0x18] sm:$0xff] %v253_v3  ;;  %v256_v6 = vld [vmem:[#allocation6 + $0x30] sm:$0xff] }
  0x5f   : > { %286 = vst [vmem:[#allocation2 + $0x50] sm:$0xff] %v254_v4  ;;  %287 = vst [vmem:[#allocation2 + $0x68] sm:$0xff] %v255_v5  ;;  %v257_v7 = vld [vmem:[#allocation6 + $0x38] sm:$0xff]  ;;  %v258_v8 = vld [vmem:[#allocation6 + $0x40] sm:$0xff] }
  0x60   : > { %288 = vst [vmem:[#allocation2 + $0x30] sm:$0xff] %v256_v6  ;;  %289 = vst [vmem:[#allocation2 + $0x48] sm:$0xff] %v257_v7  ;;  %v259_v9 = vld [vmem:[#allocation6 + $0x48] sm:$0xff]  ;;  %v260_v10 = vld [vmem:[#allocation6 + $0x50] sm:$0xff] }
  0x61   : > { %290 = vst [vmem:[#allocation2 + $0x80] sm:$0xff] %v258_v8  ;;  %v261_v11 = vld [vmem:[#allocation6 + $0x58] sm:$0xff]  ;;  %291 = vst [vmem:[#allocation2 + $0x88] sm:$0xff] %v259_v9  ;;  %v262_v12 = vld [vmem:[#allocation6 + $0x60] sm:$0xff] }
  0x62   : > { %292 = vst [vmem:[#allocation2 + $0xe8] sm:$0xff] %v260_v10  ;;  %293 = vst [vmem:[#allocation2 + $0xb8] sm:$0xff] %v261_v11  ;;  %v263_v13 = vld [vmem:[#allocation6 + $0x68] sm:$0xff]  ;;  %v264_v14 = vld [vmem:[#allocation6 + $0x70] sm:$0xff] }
  0x63   : > { %294 = vst [vmem:[#allocation2 + $0x60] sm:$0xff] %v262_v12  ;;  %295 = vst [vmem:[#allocation2 + $0xf0] sm:$0xff] %v263_v13  ;;  %v265_v15 = vld [vmem:[#allocation6 + $0x78] sm:$0xff]  ;;  %v266_v16 = vld [vmem:[#allocation6 + $0x80] sm:$0xff] }
  0x64   : > { %296 = vst [vmem:[#allocation2 + $0x8] sm:$0xff] %v264_v14  ;;  %v267_v17 = vld [vmem:[#allocation6 + $0x88] sm:$0xff]  ;;  %297 = vst [vmem:[#allocation2 + $0x78] sm:$0xff] %v265_v15  ;;  %v268_v18 = vld [vmem:[#allocation6 + $0x90] sm:$0xff] }
  0x65   : > { %298 = vst [vmem:[#allocation2 + $0x38] sm:$0xff] %v266_v16  ;;  %299 = vst [vmem:[#allocation2 + $0x58] sm:$0xff] %v267_v17  ;;  %v269_v19 = vld [vmem:[#allocation6 + $0x98] sm:$0xff]  ;;  %v270_v20 = vld [vmem:[#allocation6 + $0xa0] sm:$0xff] }
  0x66   : > { %300 = vst [vmem:[#allocation2 + $0x40] sm:$0xff] %v268_v18  ;;  %301 = vst [vmem:[#allocation2 + $0xc8] sm:$0xff] %v269_v19  ;;  %v271_v21 = vld [vmem:[#allocation6 + $0xa8] sm:$0xff]  ;;  %v272_v22 = vld [vmem:[#allocation6 + $0xb0] sm:$0xff] }
  0x67   : > { %302 = vst [vmem:[#allocation2 + $0xe0] sm:$0xff] %v270_v20  ;;  %v273_v23 = vld [vmem:[#allocation6 + $0xb8] sm:$0xff]  ;;  %303 = vst [vmem:[#allocation2 + $0x90] sm:$0xff] %v271_v21  ;;  %v274_v24 = vld [vmem:[#allocation6 + $0xc0] sm:$0xff] }
  0x68   : > { %304 = vst [vmem:[#allocation2 + $0x70] sm:$0xff] %v272_v22  ;;  %305 = vst [vmem:[#allocation2 + $0xc0] sm:$0xff] %v273_v23  ;;  %v275_v25 = vld [vmem:[#allocation6 + $0xc8] sm:$0xff]  ;;  %v276_v26 = vld [vmem:[#allocation6 + $0xd0] sm:$0xff] }
  0x69   : > { %306 = vst [vmem:[#allocation2 + $0xa8] sm:$0xff] %v274_v24  ;;  %307 = vst [vmem:[#allocation2 + $0xd0] sm:$0xff] %v275_v25  ;;  %v277_v27 = vld [vmem:[#allocation6 + $0xd8] sm:$0xff]  ;;  %v278_v28 = vld [vmem:[#allocation6 + $0xe0] sm:$0xff] }
  0x6a   : > { %308 = vst [vmem:[#allocation2 + $0x10] sm:$0xff] %v276_v26  ;;  %v279_v29 = vld [vmem:[#allocation6 + $0xe8] sm:$0xff]  ;;  %309 = vst [vmem:[#allocation2 + $0x28] sm:$0xff] %v277_v27  ;;  %v280_v30 = vld [vmem:[#allocation6 + $0xf0] sm:$0xff] }
  0x6b   : > { %310 = vst [vmem:[#allocation2 + $0xa0] sm:$0xff] %v278_v28  ;;  %311 = vst [vmem:[#allocation2 + $0xf8] sm:$0xff] %v279_v29  ;;  %v281_v31 = vld [vmem:[#allocation6 + $0xf8] sm:$0xff] }
  0x6c   : > { %312 = vst [vmem:[#allocation2 + $0x20] sm:$0xff] %v280_v30  ;;  %313 = vst [vmem:[#allocation2 + $0x98] sm:$0xff] %v281_v31 }
  0x6d PF: > { %v361_v32 = vld [vmem:[%s1934_s27 + $0x78] sm:$0xff]  ;;  %v360_v33 = vld [vmem:[%s1934_s27 + $0x70] sm:$0xff]  ;;  %v359_v34 = vld [vmem:[%s1934_s27 + $0x68] sm:$0xff]  ;;  %p963_p13 = scmp.eq.s32.totalorder %s1816_s19, 2  ;;  %p1231_p2 = scmp.ne.s32.totalorder %s1816_s19, 2 }
  0x6e   : > { %1397 = vmatprep.subr.mxu0 %v361_v32  ;;  %v358_v35 = vld [vmem:[%s1934_s27 + $0x60] sm:$0xff]  ;;  %v314_v36 = vld [vmem:[#allocation2 + $0xb0] sm:$0xff]  ;;  %v357_v37 = vld [vmem:[%s1934_s27 + $0x58] sm:$0xff] }
  0x6f   : > { %1398 = vmatpush3.msra.mxu0 %v361_v32  ;;  %1429 = vmatprep.mubr.f32.mxu0 %v314_v36  ;;  %v356_v38 = vld [vmem:[%s1934_s27 + $0x50] sm:$0xff]  ;;  %v355_v39 = vld [vmem:[%s1934_s27 + $0x48] sm:$0xff]  ;;  %v354_v40 = vld [vmem:[%s1934_s27 + $0x40] sm:$0xff]  ;;  %s996_s25 = scalar_select %p963_p13, 1, 0 }
  0x70   : > { %1399 = vmatprep.subr.mxu0 %v360_v33  ;;  %v353_v41 = vld [vmem:[%s1934_s27 + $0x38] sm:$0xff]  ;;  %v352_v42 = vld [vmem:[%s1934_s27 + $0x30] sm:$0xff]  ;;  %v351_v43 = vld [vmem:[%s1934_s27 + $0x28] sm:$0xff] }
  0x71   : > { %1400 = vmatpush3.msra.mxu0 %v360_v33  ;;  %v350_v44 = vld [vmem:[%s1934_s27 + $0x20] sm:$0xff]  ;;  %v349_v45 = vld [vmem:[%s1934_s27 + $0x18] sm:$0xff]  ;;  %v348_v46 = vld [vmem:[%s1934_s27 + $0x10] sm:$0xff] }
  0x72   : > { %1401 = vmatprep.subr.mxu0 %v359_v34  ;;  %v347_v47 = vld [vmem:[%s1934_s27 + $0x8] sm:$0xff]  ;;  %v346_v48 = vld [vmem:[%s1934_s27] sm:$0xff]  ;;  %v316_v50 = vld [vmem:[#allocation2 + $0xd8] sm:$0xff] }
  0x73   : > { %1402 = vmatpush3.msra.mxu0 %v359_v34  ;;  %v315_v49 = vld [vmem:[#allocation2] sm:$0xff]  ;;  %v317_v51 = vld [vmem:[#allocation2 + $0x18] sm:$0xff]  ;;  %v318_v52 = vld [vmem:[#allocation2 + $0x50] sm:$0xff] }
  0x74   : > { %1403 = vmatprep.subr.mxu0 %v358_v35  ;;  %v319_v53 = vld [vmem:[#allocation2 + $0x68] sm:$0xff]  ;;  %v320_v54 = vld [vmem:[#allocation2 + $0x30] sm:$0xff]  ;;  %v322_v56 = vld [vmem:[#allocation2 + $0x80] sm:$0xff] }
  0x75   : > { %1404 = vmatpush3.msra.mxu0 %v358_v35  ;;  %v321_v55 = vld [vmem:[#allocation2 + $0x48] sm:$0xff]  ;;  %v325_v59 = vld [vmem:[#allocation2 + $0xb8] sm:$0xff]  ;;  %v326_v60 = vld [vmem:[#allocation2 + $0x60] sm:$0xff] }
  0x76   : > { %1405 = vmatprep.subr.mxu0 %v357_v37  ;;  %v323_v57 = vld [vmem:[#allocation2 + $0x88] sm:$0xff]  ;;  %v327_v61 = vld [vmem:[#allocation2 + $0xf0] sm:$0xff]  ;;  %v329_v63 = vld [vmem:[#allocation2 + $0x78] sm:$0xff] }
  0x77   : > { %1406 = vmatpush3.msra.mxu0 %v357_v37  ;;  %v324_v58 = vld [vmem:[#allocation2 + $0xe8] sm:$0xff]  ;;  %v330_v0 = vld [vmem:[#allocation2 + $0x38] sm:$0xff]  ;;  %v332_v2 = vld [vmem:[#allocation2 + $0x40] sm:$0xff] }
  0x78   : > { %1407 = vmatprep.subr.mxu0 %v356_v38  ;;  %v328_v62 = vld [vmem:[#allocation2 + $0x8] sm:$0xff]  ;;  %v331_v1 = vld [vmem:[#allocation2 + $0x58] sm:$0xff]  ;;  %v334_v4 = vld [vmem:[#allocation2 + $0xe0] sm:$0xff] }
  0x79   : > { %1408 = vmatpush3.msra.mxu0 %v356_v38  ;;  %v333_v3 = vld [vmem:[#allocation2 + $0xc8] sm:$0xff]  ;;  %v335_v5 = vld [vmem:[#allocation2 + $0x90] sm:$0xff]  ;;  %v337_v7 = vld [vmem:[#allocation2 + $0xc0] sm:$0xff] }
  0x7a   : > { %1409 = vmatprep.subr.mxu0 %v355_v39  ;;  %v336_v6 = vld [vmem:[#allocation2 + $0x70] sm:$0xff]  ;;  %v338_v8 = vld [vmem:[#allocation2 + $0xa8] sm:$0xff]  ;;  %v342_v12 = vld [vmem:[#allocation2 + $0xa0] sm:$0xff] }
  0x7b   : > { %1410 = vmatpush3.msra.mxu0 %v355_v39  ;;  %v339_v9 = vld [vmem:[#allocation2 + $0xd0] sm:$0xff]  ;;  %v341_v11 = vld [vmem:[#allocation2 + $0x28] sm:$0xff]  ;;  %v343_v13 = vld [vmem:[#allocation2 + $0xf8] sm:$0xff] }
  0x7c   : > { %1411 = vmatprep.subr.mxu0 %v354_v40  ;;  %v340_v10 = vld [vmem:[#allocation2 + $0x10] sm:$0xff]  ;;  %v344_v14 = vld [vmem:[#allocation2 + $0x20] sm:$0xff]  ;;  %v345_v15 = vld [vmem:[#allocation2 + $0x98] sm:$0xff] }
  0x7d   : > { %1412 = vmatpush3.msra.mxu0 %v354_v40  ;;  %v1566_v16 = vld [vmem:[#allocation3 + $0x44] ss:$8 sps:$4 sm:$0xff]  }
  0x7e   : > { %1413 = vmatprep.subr.mxu0 %v353_v41  ;;  %866 = vmatprep.mubr.bf16.mxu1 %v1566_v16  ;;  %v1587_v30 = vld [vmem:[#allocation3 + $0x4] ss:$8 sps:$4 sm:$0xff]  }
  0x7f   : > { %1414 = vmatpush3.msra.mxu0 %v353_v41  ;;  %v1576_v16 = vld [vmem:[#allocation3 + $0x84] ss:$8 sps:$4 sm:$0xff]  }
  0x80   : > { %1415 = vmatprep.subr.mxu0 %v352_v42 }
  0x81   : > { %1416 = vmatpush3.msra.mxu0 %v352_v42 }
  0x82   : > { %1417 = vmatprep.subr.mxu0 %v351_v43 }
  0x83   : > { %1418 = vmatpush3.msra.mxu0 %v351_v43 }
  0x84   : > { %1419 = vmatprep.subr.mxu0 %v350_v44 }
  0x85   : > { %1420 = vmatpush3.msra.mxu0 %v350_v44 }
  0x86   : > { %1421 = vmatprep.subr.mxu0 %v349_v45 }
  0x87   : > { %1422 = vmatpush3.msra.mxu0 %v349_v45 }
  0x88   : > { %1423 = vmatprep.subr.mxu0 %v348_v46 }
  0x89   : > { %1424 = vmatpush3.msra.mxu0 %v348_v46 }
  0x8a   : > { %1425 = vmatprep.subr.mxu0 %v347_v47 }
  0x8b   : > { %1426 = vmatpush3.msra.mxu0 %v347_v47 }
  0x8c   : > { %1427 = vmatprep.subr.mxu0 %v346_v48 }
  0x8d   : > { %1428 = vmatpush3.msra.mxu0 %v346_v48 }
  0x8e   : > { %1430 = vmatmul.mubr.f32.vlgmr.msra.gmra.mxu0 %v315_v49 }
  0x8f   : > { %1432 = vmatprep.mubr.f32.mxu0 %v316_v50 }
  0x92   : > { %1433 = vmatmul.mubr.f32.gmra.mxu0 %v317_v51 }
  0x93   : > { %1435 = vmatprep.mubr.f32.mxu0 %v318_v52 }
  0x96   : > { %1436 = vmatmul.mubr.f32.gmra.mxu0 %v319_v53 }
  0x97   : > { %1438 = vmatprep.mubr.f32.mxu0 %v320_v54 }
  0x9a   : > { %1439 = vmatmul.mubr.f32.gmra.mxu0 %v321_v55 }
  0x9b   : > { %1441 = vmatprep.mubr.f32.mxu0 %v322_v56 }
  0x9e   : > { %1442 = vmatmul.mubr.f32.gmra.mxu0 %v323_v57 }
  0x9f   : > { %1444 = vmatprep.mubr.f32.mxu0 %v324_v58 }
  0xa2   : > { %1445 = vmatmul.mubr.f32.gmra.mxu0 %v325_v59 }
  0xa3   : > { %1447 = vmatprep.mubr.f32.mxu0 %v326_v60 }
  0xa6   : > { %1448 = vmatmul.mubr.f32.gmra.mxu0 %v327_v61 }
  0xa7   : > { %1450 = vmatprep.mubr.f32.mxu0 %v328_v62 }
  0xaa   : > { %1451 = vmatmul.mubr.f32.gmra.mxu0 %v329_v63 }
  0xab   : > { %1453 = vmatprep.mubr.f32.mxu0 %v330_v0 }
  0xae   : > { %1454 = vmatmul.mubr.f32.gmra.mxu0 %v331_v1 }
  0xaf   : > { %1456 = vmatprep.mubr.f32.mxu0 %v332_v2  ;;  %v1564_v2 = vld [vmem:[#allocation3 + $0x40] ss:$8 sps:$4 sm:$0xff]  }
  0xb2   : > { %1457 = vmatmul.mubr.f32.gmra.mxu0 %v333_v3  ;;  %v1585_v3 = vld [vmem:[#allocation3] ss:$8 sps:$4 sm:$0xff]  }
  0xb3   : > { %1459 = vmatprep.mubr.f32.mxu0 %v334_v4  ;;  %v1567_v4 = vld [vmem:[#allocation3 + $0x54] ss:$8 sps:$4 sm:$0xff]  }
  0xb6   : > { %1460 = vmatmul.mubr.f32.gmra.mxu0 %v335_v5  ;;  %v1591_v5 = vld [vmem:[#allocation3 + $0x14] ss:$8 sps:$4 sm:$0xff]  }
  0xb7   : > { %1462 = vmatprep.mubr.f32.mxu0 %v336_v6  ;;  %v1569_v6 = vld [vmem:[#allocation3 + $0x50] ss:$8 sps:$4 sm:$0xff]  }
  0xba   : > { %1463 = vmatmul.mubr.f32.gmra.mxu0 %v337_v7  ;;  %v1595_v7 = vld [vmem:[#allocation3 + $0x10] ss:$8 sps:$4 sm:$0xff]  }
  0xbb   : > { %1465 = vmatprep.mubr.f32.mxu0 %v338_v8  ;;  %v1570_v8 = vld [vmem:[#allocation3 + $0x64] ss:$8 sps:$4 sm:$0xff]  }
  0xbe   : > { %1466 = vmatmul.mubr.f32.gmra.mxu0 %v339_v9  ;;  %v1597_v9 = vld [vmem:[#allocation3 + $0x24] ss:$8 sps:$4 sm:$0xff]  }
  0xbf   : > { %1468 = vmatprep.mubr.f32.mxu0 %v340_v10  ;;  %v1572_v10 = vld [vmem:[#allocation3 + $0x60] ss:$8 sps:$4 sm:$0xff]  }
  0xc2   : > { %1469 = vmatmul.mubr.f32.gmra.mxu0 %v341_v11  ;;  %v1601_v11 = vld [vmem:[#allocation3 + $0x20] ss:$8 sps:$4 sm:$0xff]  }
  0xc3   : > { %1471 = vmatprep.mubr.f32.mxu0 %v342_v12  ;;  %v1573_v12 = vld [vmem:[#allocation3 + $0x74] ss:$8 sps:$4 sm:$0xff]  }
  0xc6   : > { %1472 = vmatmul.mubr.f32.gmra.mxu0 %v343_v13  ;;  %v1603_v13 = vld [vmem:[#allocation3 + $0x34] ss:$8 sps:$4 sm:$0xff]  }
  0xc7   : > { %1474 = vmatprep.mubr.f32.mxu0 %v344_v14  ;;  %v1575_v14 = vld [vmem:[#allocation3 + $0x70] ss:$8 sps:$4 sm:$0xff]  }
  0xca   : > { %1475 = vmatmul.mubr.f32.gmra.mxu0 %v345_v15  ;;  %v1607_v15 = vld [vmem:[#allocation3 + $0x30] ss:$8 sps:$4 sm:$0xff]  }
  0xcb   : > { %834 = vmatprep.mubr.bf16.mxu0 %v1587_v30  ;;  %v1609_v30 = vld [vmem:[#allocation3 + $0xf4] ss:$8 sps:$4 sm:$0xff]  }
 0x14e   : > { %v1431_v17 = vpop.f32.mrf.mxu0 }
 0x150   : > { %v428_v18 = vpop.f32.mrf.mxu0 }
 0x151   : > { %v1966_v19 = vpack.c.bf16 %v1431_v17, %v428_v18  ;;  %v1578_v17 = vld [vmem:[#allocation3 + $0x80] ss:$8 sps:$4 sm:$0xff]   ;;  %v1579_v18 = vld [vmem:[#allocation3 + $0x94] ss:$8 sps:$4 sm:$0xff]  }
 0x152   : > { %v1434_v20 = vpop.f32.mrf.mxu0 }
 0x154   : > { %v438_v21 = vpop.f32.mrf.mxu0 }
 0x155   : > { %v1968_v22 = vpack.c.bf16 %v1434_v20, %v438_v21  ;;  %v1582_v20 = vld [vmem:[#allocation3 + $0xa4] ss:$8 sps:$4 sm:$0xff]   ;;  %v1584_v21 = vld [vmem:[#allocation3 + $0xa0] ss:$8 sps:$4 sm:$0xff]  }
 0x156   : > { %v1437_v23 = vpop.f32.mrf.mxu0 }
 0x158   : > { %v448_v24 = vpop.f32.mrf.mxu0 }
 0x159   : > { %v1970_v25 = vpack.c.bf16 %v1437_v23, %v448_v24  ;;  %v1590_v23 = vld [vmem:[#allocation3 + $0xb0] ss:$8 sps:$4 sm:$0xff]   ;;  %v1593_v24 = vld [vmem:[#allocation3 + $0xc4] ss:$8 sps:$4 sm:$0xff]  }
 0x15a   : > { %v1440_v26 = vpop.f32.mrf.mxu0 }
 0x15c   : > { %v458_v27 = vpop.f32.mrf.mxu0 }
 0x15d   : > { %v622_v28 = vpack.c.bf16 %v1440_v26, %v458_v27  ;;  %v1599_v26 = vld [vmem:[#allocation3 + $0xd4] ss:$8 sps:$4 sm:$0xff]   ;;  %v1602_v27 = vld [vmem:[#allocation3 + $0xd0] ss:$8 sps:$4 sm:$0xff]  }
 0x15e   : > { %v1443_v29 = vpop.f32.mrf.mxu0 }
 0x160   : > { %v468_v31 = vpop.f32.mrf.mxu0 }
 0x161   : > { %v623_v61 = vpack.c.bf16 %v1443_v29, %v468_v31  ;;  %v1608_v29 = vld [vmem:[#allocation3 + $0xe0] ss:$8 sps:$4 sm:$0xff]   ;;  %v1611_v31 = vld [vmem:[#allocation3 + $0xf0] ss:$8 sps:$4 sm:$0xff]  }
 0x162   : > { %v1446_v32 = vpop.f32.mrf.mxu0 }
 0x164   : > { %v478_v33 = vpop.f32.mrf.mxu0 }
 0x165   : > { %v624_v59 = vpack.c.bf16 %v1446_v32, %v478_v33 }
 0x166   : > { %v1449_v34 = vpop.f32.mrf.mxu0 }
 0x168   : > { %v488_v35 = vpop.f32.mrf.mxu0 }
 0x169   : > { %v625_v57 = vpack.c.bf16 %v1449_v34, %v488_v35  ;;  %v1986_v34 = vld [vmem:[%s244_s8] ss:$0 sm:$0xff] }
 0x16a   : > { %v1452_v36 = vpop.f32.mrf.mxu0 }
 0x16c   : > { %v498_v37 = vpop.f32.mrf.mxu0 }
 0x16d   : > { %v626_v55 = vpack.c.bf16 %v1452_v36, %v498_v37 }
 0x16e   : > { %v1455_v38 = vpop.f32.mrf.mxu0 }
 0x170   : > { %v508_v39 = vpop.f32.mrf.mxu0 }
 0x171   : > { %v627_v1 = vpack.c.bf16 %v1455_v38, %v508_v39  ;;  %v997_v38 = vstv %s996_s25 }
 0x172   : > { %v1458_v40 = vpop.f32.mrf.mxu0  ;;  %vm1990_vm0 = vcmp.eq.s32.totalorder %v997_v38, 1 }
 0x174   : > { %v518_v41 = vpop.f32.mrf.mxu0 }
 0x175   : > { %v628_v0 = vpack.c.bf16 %v1458_v40, %v518_v41 }
 0x176   : > { %v1461_v42 = vpop.f32.mrf.mxu0 }
 0x178   : > { %v528_v43 = vpop.f32.mrf.mxu0 }
 0x179   : > { %v629_v63 = vpack.c.bf16 %v1461_v42, %v528_v43 }
 0x17a   : > { %v1464_v44 = vpop.f32.mrf.mxu0 }
 0x17c   : > { %v538_v45 = vpop.f32.mrf.mxu0 }
 0x17d   : > { %v630_v62 = vpack.c.bf16 %v1464_v44, %v538_v45 }
 0x17e   : > { %v1467_v46 = vpop.f32.mrf.mxu0 }
 0x180   : > { %v548_v47 = vpop.f32.mrf.mxu0 }
 0x181   : > { %v631_v60 = vpack.c.bf16 %v1467_v46, %v548_v47 }
 0x182   : > { %v1470_v48 = vpop.f32.mrf.mxu0 }
 0x184   : > { %v558_v49 = vpop.f32.mrf.mxu0 }
 0x185   : > { %v632_v58 = vpack.c.bf16 %v1470_v48, %v558_v49 }
 0x186   : > { %v1473_v50 = vpop.f32.mrf.mxu0 }
 0x188   : > { %v568_v51 = vpop.f32.mrf.mxu0 }
 0x189   : > { %v633_v56 = vpack.c.bf16 %v1473_v50, %v568_v51 }
 0x18a   : > { %v1476_v52 = vpop.f32.mrf.mxu0 }
 0x18c   : > { %v578_v53 = vpop.f32.mrf.mxu0 }
 0x18d   : > { %v634_v54 = vpack.c.bf16 %v1476_v52, %v578_v53 }
 0x18f   : > { %1285 = vmatprep.subr.bf16.mxu0 %v634_v54  ;;  %1477 = vmatprep.subr.bf16.mxu1 %v634_v54 }
 0x190   : > { %1286 = vmatpush3.bf16.msra.mxu0 %v626_v55  ;;  %1485 = vmatpush3.bf16.msra.mxu1 %v626_v55 }
 0x191   : > { %1287 = vmatprep.subr.bf16.mxu0 %v633_v56  ;;  %1478 = vmatprep.subr.bf16.mxu1 %v633_v56 }
 0x194   : > { %1288 = vmatpush3.bf16.msra.mxu0 %v625_v57  ;;  %1486 = vmatpush3.bf16.msra.mxu1 %v625_v57 }
 0x195   : > { %1289 = vmatprep.subr.bf16.mxu0 %v632_v58  ;;  %1479 = vmatprep.subr.bf16.mxu1 %v632_v58 }
 0x198   : > { %1290 = vmatpush3.bf16.msra.mxu0 %v624_v59  ;;  %1487 = vmatpush3.bf16.msra.mxu1 %v624_v59 }
 0x199   : > { %1291 = vmatprep.subr.bf16.mxu0 %v631_v60  ;;  %1480 = vmatprep.subr.bf16.mxu1 %v631_v60 }
 0x19c   : > { %1292 = vmatpush3.bf16.msra.mxu0 %v623_v61  ;;  %1488 = vmatpush3.bf16.msra.mxu1 %v623_v61 }
 0x19d   : > { %1293 = vmatprep.subr.bf16.mxu0 %v630_v62  ;;  %1481 = vmatprep.subr.bf16.mxu1 %v630_v62 }
 0x1a0   : > { %1294 = vmatpush3.bf16.msra.mxu0 %v622_v28  ;;  %1489 = vmatpush3.bf16.msra.mxu1 %v622_v28  ;;  %v1605_v28 = vld [vmem:[#allocation3 + $0xe4] ss:$8 sps:$4 sm:$0xff]  }
 0x1a1   : > { %1295 = vmatprep.subr.bf16.mxu0 %v629_v63  ;;  %1482 = vmatprep.subr.bf16.mxu1 %v629_v63 }
 0x1a4   : > { %1296 = vmatpush3.bf16.msra.mxu0 %v1970_v25  ;;  %1490 = vmatpush3.bf16.msra.mxu1 %v1970_v25  ;;  %v1596_v25 = vld [vmem:[#allocation3 + $0xc0] ss:$8 sps:$4 sm:$0xff]  }
 0x1a5   : > { %1297 = vmatprep.subr.bf16.mxu0 %v628_v0  ;;  %1483 = vmatprep.subr.bf16.mxu1 %v628_v0 }
 0x1a8   : > { %1298 = vmatpush3.bf16.msra.mxu0 %v1968_v22  ;;  %1491 = vmatpush3.bf16.msra.mxu1 %v1968_v22  ;;  %v1588_v22 = vld [vmem:[#allocation3 + $0xb4] ss:$8 sps:$4 sm:$0xff]  }
 0x1a9   : > { %1299 = vmatprep.subr.bf16.mxu0 %v627_v1  ;;  %1484 = vmatprep.subr.bf16.mxu1 %v627_v1 }
 0x1ac   : > { %1300 = vmatpush3.bf16.msra.mxu0 %v1966_v19  ;;  %1492 = vmatpush3.bf16.msra.mxu1 %v1966_v19  ;;  %v1581_v19 = vld [vmem:[#allocation3 + $0x90] ss:$8 sps:$4 sm:$0xff]  }
 0x1af   : > { %867 = vmatmul.mubr.bf16.vlgmr.msra.gmra.mxu1 %v1564_v2  ;;  %835 = vmatmul.mubr.bf16.vlgmr.msra.gmra.mxu0 %v1585_v3 }
 0x1b0   : > { %874 = vmatprep.mubr.bf16.mxu1 %v1567_v4  ;;  %842 = vmatprep.mubr.bf16.mxu0 %v1591_v5 }
 0x1b7   : > { %875 = vmatmul.mubr.bf16.gmra.mxu1 %v1569_v6  ;;  %843 = vmatmul.mubr.bf16.gmra.mxu0 %v1595_v7 }
 0x1b8   : > { %882 = vmatprep.mubr.bf16.mxu1 %v1570_v8  ;;  %850 = vmatprep.mubr.bf16.mxu0 %v1597_v9 }
 0x1bf   : > { %883 = vmatmul.mubr.bf16.gmra.mxu1 %v1572_v10  ;;  %851 = vmatmul.mubr.bf16.gmra.mxu0 %v1601_v11 }
 0x1c0   : > { %890 = vmatprep.mubr.bf16.mxu1 %v1573_v12  ;;  %858 = vmatprep.mubr.bf16.mxu0 %v1603_v13 }
 0x1c7   : > { %891 = vmatmul.mubr.bf16.gmra.mxu1 %v1575_v14  ;;  %859 = vmatmul.mubr.bf16.gmra.mxu0 %v1607_v15 }
 0x1c8   : > { %898 = vmatprep.mubr.bf16.mxu1 %v1576_v16 }
 0x1cf   : > { %899 = vmatmul.mubr.bf16.gmra.mxu1 %v1578_v17 }
 0x1d0   : > { %906 = vmatprep.mubr.bf16.mxu1 %v1579_v18 }
 0x1d7   : > { %907 = vmatmul.mubr.bf16.gmra.mxu1 %v1581_v19 }
 0x1d8   : > { %914 = vmatprep.mubr.bf16.mxu1 %v1582_v20 }
 0x1df   : > { %915 = vmatmul.mubr.bf16.gmra.mxu1 %v1584_v21 }
 0x1e0   : > { %922 = vmatprep.mubr.bf16.mxu1 %v1588_v22 }
 0x1e7   : > { %923 = vmatmul.mubr.bf16.gmra.mxu1 %v1590_v23 }
 0x1e8   : > { %930 = vmatprep.mubr.bf16.mxu1 %v1593_v24 }
 0x1ef   : > { %931 = vmatmul.mubr.bf16.gmra.mxu1 %v1596_v25 }
 0x1f0   : > { %938 = vmatprep.mubr.bf16.mxu1 %v1599_v26 }
 0x1f7   : > { %939 = vmatmul.mubr.bf16.gmra.mxu1 %v1602_v27 }
 0x1f8   : > { %946 = vmatprep.mubr.bf16.mxu1 %v1605_v28 }
 0x1ff   : > { %947 = vmatmul.mubr.bf16.gmra.mxu1 %v1608_v29 }
 0x200   : > { %954 = vmatprep.mubr.bf16.mxu1 %v1609_v30 }
 0x207   : > { %955 = vmatmul.mubr.bf16.gmra.mxu1 %v1611_v31 }
 0x26f   : > { %v1325_v32 = vpop.f32.mrf.mxu1  ;;  %v1301_v33 = vpop.f32.mrf.mxu0 }
 0x271   : > { %v1326_v35 = vpop.f32.mrf.mxu1  ;;  %v1302_v36 = vpop.f32.mrf.mxu0 }
 0x272   : > { %v1327_v37 = vadd.f32 %v1326_v35, %v1325_v32  ;;  %v1303_v39 = vadd.f32 %v1302_v36, %v1301_v33 }
 0x273   : > { %v1328_v40 = vpop.f32.mrf.mxu1  ;;  %v1304_v41 = vpop.f32.mrf.mxu0 }
 0x274   : > { %v869_v42 = vadd.f32 %v1327_v37, %v1986_v34  ;;  %v837_v43 = vadd.f32 %v1303_v39, %v1986_v34 }
 0x275   : > { %v1329_v45 = vpop.f32.mrf.mxu1  ;;  %v1305_v46 = vpop.f32.mrf.mxu0 }
 0x276   : > { %v972_v47 = vmax.f32 %v869_v42, 0.0  ;;  %v1330_v48 = vadd.f32 %v1329_v45, %v1328_v40  ;;  %v964_v49 = vmax.f32 %v837_v43, 0.0  ;;  %v1306_v50 = vadd.f32 %v1305_v46, %v1304_v41 }
 0x277   : > { %v1331_v51 = vpop.f32.mrf.mxu1  ;;  %v1307_v52 = vpop.f32.mrf.mxu0 }
 0x278   : > { %v1996_v53 = vsel %vm1990_vm0, %v869_v42, %v972_v47  ;;  %v872_v54 = vadd.f32 %v1330_v48, %v1986_v34  ;;  %v2001_v55 = vsel %vm1990_vm0, %v837_v43, %v964_v49  ;;  %v840_v56 = vadd.f32 %v1306_v50, %v1986_v34 }
 0x279   : > { %1039 = vst [vmem:[#allocation2 + $0x80] sm:$0xff] %v1996_v53  ;;  %v1332_v57 = vpop.f32.mrf.mxu1  ;;  %1031 = vst [vmem:[#allocation2 + $0xb0] sm:$0xff] %v2001_v55  ;;  %v1308_v58 = vpop.f32.mrf.mxu0 }
 0x27a   : > { %v973_v59 = vmax.f32 %v872_v54, 0.0  ;;  %v1333_v60 = vadd.f32 %v1332_v57, %v1331_v51  ;;  %v965_v61 = vmax.f32 %v840_v56, 0.0  ;;  %v1309_v62 = vadd.f32 %v1308_v58, %v1307_v52 }
 0x27b   : > { %v1334_v63 = vpop.f32.mrf.mxu1  ;;  %v1310_v0 = vpop.f32.mrf.mxu0 }
 0x27c   : > { %v2008_v1 = vsel %vm1990_vm0, %v872_v54, %v973_v59  ;;  %v877_v2 = vadd.f32 %v1333_v60, %v1986_v34  ;;  %v2013_v3 = vsel %vm1990_vm0, %v840_v56, %v965_v61  ;;  %v845_v4 = vadd.f32 %v1309_v62, %v1986_v34 }
 0x27d   : > { %1040 = vst [vmem:[#allocation2 + $0x88] sm:$0xff] %v2008_v1  ;;  %v1335_v5 = vpop.f32.mrf.mxu1  ;;  %1032 = vst [vmem:[#allocation2] sm:$0xff] %v2013_v3  ;;  %v1311_v6 = vpop.f32.mrf.mxu0 }
 0x27e   : > { %v974_v7 = vmax.f32 %v877_v2, 0.0  ;;  %v1336_v8 = vadd.f32 %v1335_v5, %v1334_v63  ;;  %v966_v9 = vmax.f32 %v845_v4, 0.0  ;;  %v1312_v10 = vadd.f32 %v1311_v6, %v1310_v0 }
 0x27f   : > { %v1337_v11 = vpop.f32.mrf.mxu1  ;;  %v1313_v12 = vpop.f32.mrf.mxu0 }
 0x280   : > { %v2020_v13 = vsel %vm1990_vm0, %v877_v2, %v974_v7  ;;  %v880_v14 = vadd.f32 %v1336_v8, %v1986_v34  ;;  %v2025_v15 = vsel %vm1990_vm0, %v845_v4, %v966_v9  ;;  %v848_v16 = vadd.f32 %v1312_v10, %v1986_v34 }
 0x281   : > { %1041 = vst [vmem:[#allocation2 + $0xe8] sm:$0xff] %v2020_v13  ;;  %v1338_v17 = vpop.f32.mrf.mxu1  ;;  %1033 = vst [vmem:[#allocation2 + $0xd8] sm:$0xff] %v2025_v15  ;;  %v1314_v18 = vpop.f32.mrf.mxu0 }
 0x282   : > { %v975_v19 = vmax.f32 %v880_v14, 0.0  ;;  %v1339_v20 = vadd.f32 %v1338_v17, %v1337_v11  ;;  %v967_v21 = vmax.f32 %v848_v16, 0.0  ;;  %v1315_v22 = vadd.f32 %v1314_v18, %v1313_v12 }
 0x283   : > { %v1340_v23 = vpop.f32.mrf.mxu1  ;;  %v1316_v24 = vpop.f32.mrf.mxu0 }
 0x284   : > { %v2032_v25 = vsel %vm1990_vm0, %v880_v14, %v975_v19  ;;  %v885_v26 = vadd.f32 %v1339_v20, %v1986_v34  ;;  %v2037_v27 = vsel %vm1990_vm0, %v848_v16, %v967_v21  ;;  %v853_v28 = vadd.f32 %v1315_v22, %v1986_v34 }
 0x285   : > { %1042 = vst [vmem:[#allocation2 + $0xb8] sm:$0xff] %v2032_v25  ;;  %v1341_v29 = vpop.f32.mrf.mxu1  ;;  %1034 = vst [vmem:[#allocation2 + $0x18] sm:$0xff] %v2037_v27  ;;  %v1317_v30 = vpop.f32.mrf.mxu0 }
 0x286   : > { %v976_v31 = vmax.f32 %v885_v26, 0.0  ;;  %v1342_v32 = vadd.f32 %v1341_v29, %v1340_v23  ;;  %v968_v33 = vmax.f32 %v853_v28, 0.0  ;;  %v1318_v35 = vadd.f32 %v1317_v30, %v1316_v24 }
 0x287   : > { %v1343_v36 = vpop.f32.mrf.mxu1  ;;  %v1319_v37 = vpop.f32.mrf.mxu0 }
 0x288   : > { %v2044_v38 = vsel %vm1990_vm0, %v885_v26, %v976_v31  ;;  %v888_v39 = vadd.f32 %v1342_v32, %v1986_v34  ;;  %v2049_v40 = vsel %vm1990_vm0, %v853_v28, %v968_v33  ;;  %v856_v41 = vadd.f32 %v1318_v35, %v1986_v34 }
 0x289   : > { %1043 = vst [vmem:[#allocation2 + $0x60] sm:$0xff] %v2044_v38  ;;  %v1344_v42 = vpop.f32.mrf.mxu1  ;;  %1035 = vst [vmem:[#allocation2 + $0x50] sm:$0xff] %v2049_v40  ;;  %v1320_v43 = vpop.f32.mrf.mxu0 }
 0x28a   : > { %v977_v45 = vmax.f32 %v888_v39, 0.0  ;;  %v1345_v46 = vadd.f32 %v1344_v42, %v1343_v36  ;;  %v969_v47 = vmax.f32 %v856_v41, 0.0  ;;  %v1321_v48 = vadd.f32 %v1320_v43, %v1319_v37 }
 0x28b   : > { %v1346_v49 = vpop.f32.mrf.mxu1  ;;  %v1322_v50 = vpop.f32.mrf.mxu0 }
 0x28c   : > { %v2056_v51 = vsel %vm1990_vm0, %v888_v39, %v977_v45  ;;  %v893_v52 = vadd.f32 %v1345_v46, %v1986_v34  ;;  %v2061_v54 = vsel %vm1990_vm0, %v856_v41, %v969_v47  ;;  %v861_v56 = vadd.f32 %v1321_v48, %v1986_v34 }
 0x28d   : > { %1044 = vst [vmem:[#allocation2 + $0xf0] sm:$0xff] %v2056_v51  ;;  %v1347_v57 = vpop.f32.mrf.mxu1  ;;  %1036 = vst [vmem:[#allocation2 + $0x68] sm:$0xff] %v2061_v54  ;;  %v1323_v58 = vpop.f32.mrf.mxu0 }
 0x28e   : > { %v978_v59 = vmax.f32 %v893_v52, 0.0  ;;  %v1348_v60 = vadd.f32 %v1347_v57, %v1346_v49  ;;  %v970_v61 = vmax.f32 %v861_v56, 0.0  ;;  %v1324_v62 = vadd.f32 %v1323_v58, %v1322_v50 }
 0x28f   : > { %v1349_v63 = vpop.f32.mrf.mxu1 }
 0x290   : > { %v2068_v0 = vsel %vm1990_vm0, %v893_v52, %v978_v59  ;;  %v896_v2 = vadd.f32 %v1348_v60, %v1986_v34  ;;  %v2073_v4 = vsel %vm1990_vm0, %v861_v56, %v970_v61  ;;  %v864_v5 = vadd.f32 %v1324_v62, %v1986_v34 }
 0x291   : > { %1045 = vst [vmem:[#allocation2 + $0x8] sm:$0xff] %v2068_v0  ;;  %v1350_v6 = vpop.f32.mrf.mxu1  ;;  %1037 = vst [vmem:[#allocation2 + $0x30] sm:$0xff] %v2073_v4 }
 0x292   : > { %v979_v7 = vmax.f32 %v896_v2, 0.0  ;;  %v1351_v8 = vadd.f32 %v1350_v6, %v1349_v63  ;;  %v971_v9 = vmax.f32 %v864_v5, 0.0 }
 0x293   : > { %v1352_v10 = vpop.f32.mrf.mxu1 }
 0x294   : > { %v2080_v11 = vsel %vm1990_vm0, %v896_v2, %v979_v7  ;;  %v901_v12 = vadd.f32 %v1351_v8, %v1986_v34  ;;  %v2085_v14 = vsel %vm1990_vm0, %v864_v5, %v971_v9 }
 0x295   : > { %1046 = vst [vmem:[#allocation2 + $0x78] sm:$0xff] %v2080_v11  ;;  %v1353_v16 = vpop.f32.mrf.mxu1  ;;  %1038 = vst [vmem:[#allocation2 + $0x48] sm:$0xff] %v2085_v14 }
 0x296   : > { %v980_v17 = vmax.f32 %v901_v12, 0.0  ;;  %v1354_v18 = vadd.f32 %v1353_v16, %v1352_v10 }
 0x297   : > { %v1355_v19 = vpop.f32.mrf.mxu1 }
 0x298   : > { %v2091_v20 = vsel %vm1990_vm0, %v901_v12, %v980_v17  ;;  %v904_v21 = vadd.f32 %v1354_v18, %v1986_v34 }
 0x299   : > { %1047 = vst [vmem:[#allocation2 + $0x38] sm:$0xff] %v2091_v20  ;;  %v1356_v22 = vpop.f32.mrf.mxu1 }
 0x29a   : > { %v981_v23 = vmax.f32 %v904_v21, 0.0  ;;  %v1357_v24 = vadd.f32 %v1356_v22, %v1355_v19 }
 0x29b   : > { %v1358_v26 = vpop.f32.mrf.mxu1 }
 0x29c   : > { %v2097_v28 = vsel %vm1990_vm0, %v904_v21, %v981_v23  ;;  %v909_v29 = vadd.f32 %v1357_v24, %v1986_v34 }
 0x29d   : > { %1048 = vst [vmem:[#allocation2 + $0x58] sm:$0xff] %v2097_v28  ;;  %v1359_v30 = vpop.f32.mrf.mxu1 }
 0x29e   : > { %v982_v31 = vmax.f32 %v909_v29, 0.0  ;;  %v1360_v32 = vadd.f32 %v1359_v30, %v1358_v26 }
 0x29f   : > { %v1361_v33 = vpop.f32.mrf.mxu1 }
 0x2a0   : > { %v2103_v35 = vsel %vm1990_vm0, %v909_v29, %v982_v31  ;;  %v912_v36 = vadd.f32 %v1360_v32, %v1986_v34 }
 0x2a1   : > { %1049 = vst [vmem:[#allocation2 + $0x40] sm:$0xff] %v2103_v35  ;;  %v1362_v37 = vpop.f32.mrf.mxu1 }
 0x2a2   : > { %v983_v39 = vmax.f32 %v912_v36, 0.0  ;;  %v1363_v41 = vadd.f32 %v1362_v37, %v1361_v33 }
 0x2a3   : > { %v1364_v42 = vpop.f32.mrf.mxu1 }
 0x2a4   : > { %v2109_v43 = vsel %vm1990_vm0, %v912_v36, %v983_v39  ;;  %v917_v45 = vadd.f32 %v1363_v41, %v1986_v34 }
 0x2a5   : > { %1050 = vst [vmem:[#allocation2 + $0xc8] sm:$0xff] %v2109_v43  ;;  %v1365_v46 = vpop.f32.mrf.mxu1 }
 0x2a6   : > { %v984_v47 = vmax.f32 %v917_v45, 0.0  ;;  %v1366_v48 = vadd.f32 %v1365_v46, %v1364_v42 }
 0x2a7   : > { %v1367_v49 = vpop.f32.mrf.mxu1 }
 0x2a8   : > { %v2115_v50 = vsel %vm1990_vm0, %v917_v45, %v984_v47  ;;  %v920_v52 = vadd.f32 %v1366_v48, %v1986_v34 }
 0x2a9   : > { %1051 = vst [vmem:[#allocation2 + $0xe0] sm:$0xff] %v2115_v50  ;;  %v1368_v56 = vpop.f32.mrf.mxu1 }
 0x2aa   : > { %v985_v57 = vmax.f32 %v920_v52, 0.0  ;;  %v1369_v58 = vadd.f32 %v1368_v56, %v1367_v49 }
 0x2ab   : > { %v1370_v59 = vpop.f32.mrf.mxu1 }
 0x2ac   : > { %v2121_v60 = vsel %vm1990_vm0, %v920_v52, %v985_v57  ;;  %v925_v61 = vadd.f32 %v1369_v58, %v1986_v34 }
 0x2ad   : > { %1052 = vst [vmem:[#allocation2 + $0x90] sm:$0xff] %v2121_v60  ;;  %v1371_v62 = vpop.f32.mrf.mxu1 }
 0x2ae   : > { %v986_v63 = vmax.f32 %v925_v61, 0.0  ;;  %v1372_v2 = vadd.f32 %v1371_v62, %v1370_v59 }
 0x2af   : > { %v1373_v5 = vpop.f32.mrf.mxu1 }
 0x2b0   : > { %v2127_v6 = vsel %vm1990_vm0, %v925_v61, %v986_v63  ;;  %v928_v7 = vadd.f32 %v1372_v2, %v1986_v34 }
 0x2b1   : > { %1053 = vst [vmem:[#allocation2 + $0x70] sm:$0xff] %v2127_v6  ;;  %v1374_v8 = vpop.f32.mrf.mxu1 }
 0x2b2   : > { %v987_v9 = vmax.f32 %v928_v7, 0.0  ;;  %v1375_v10 = vadd.f32 %v1374_v8, %v1373_v5 }
 0x2b3   : > { %v1376_v12 = vpop.f32.mrf.mxu1 }
 0x2b4   : > { %v2133_v16 = vsel %vm1990_vm0, %v928_v7, %v987_v9  ;;  %v933_v17 = vadd.f32 %v1375_v10, %v1986_v34 }
 0x2b5   : > { %1054 = vst [vmem:[#allocation2 + $0xc0] sm:$0xff] %v2133_v16  ;;  %v1377_v18 = vpop.f32.mrf.mxu1 }
 0x2b6   : > { %v988_v19 = vmax.f32 %v933_v17, 0.0  ;;  %v1378_v21 = vadd.f32 %v1377_v18, %v1376_v12 }
 0x2b7   : > { %v1379_v22 = vpop.f32.mrf.mxu1 }
 0x2b8   : > { %v2139_v23 = vsel %vm1990_vm0, %v933_v17, %v988_v19  ;;  %v936_v24 = vadd.f32 %v1378_v21, %v1986_v34 }
 0x2b9   : > { %1055 = vst [vmem:[#allocation2 + $0xa8] sm:$0xff] %v2139_v23  ;;  %v1380_v26 = vpop.f32.mrf.mxu1 }
 0x2ba   : > { %v989_v29 = vmax.f32 %v936_v24, 0.0  ;;  %v1381_v30 = vadd.f32 %v1380_v26, %v1379_v22 }
 0x2bb   : > { %v1382_v31 = vpop.f32.mrf.mxu1 }
 0x2bc   : > { %v2145_v32 = vsel %vm1990_vm0, %v936_v24, %v989_v29  ;;  %v941_v33 = vadd.f32 %v1381_v30, %v1986_v34 }
 0x2bd   : > { %1056 = vst [vmem:[#allocation2 + $0xd0] sm:$0xff] %v2145_v32  ;;  %v1383_v36 = vpop.f32.mrf.mxu1 }
 0x2be   : > { %v990_v37 = vmax.f32 %v941_v33, 0.0  ;;  %v1384_v39 = vadd.f32 %v1383_v36, %v1382_v31 }
 0x2bf   : > { %v1385_v41 = vpop.f32.mrf.mxu1 }
 0x2c0   : > { %v1025_v42 = vsel %vm1990_vm0, %v941_v33, %v990_v37  ;;  %v944_v45 = vadd.f32 %v1384_v39, %v1986_v34 }
 0x2c1   : > { %1057 = vst [vmem:[#allocation2 + $0x10] sm:$0xff] %v1025_v42  ;;  %v1386_v46 = vpop.f32.mrf.mxu1 }
 0x2c2   : > { %v991_v47 = vmax.f32 %v944_v45, 0.0  ;;  %v1387_v48 = vadd.f32 %v1386_v46, %v1385_v41 }
 0x2c3   : > { %v1388_v49 = vpop.f32.mrf.mxu1 }
 0x2c4   : > { %v1026_v52 = vsel %vm1990_vm0, %v944_v45, %v991_v47  ;;  %v949_v56 = vadd.f32 %v1387_v48, %v1986_v34 }
 0x2c5   : > { %1058 = vst [vmem:[#allocation2 + $0x28] sm:$0xff] %v1026_v52  ;;  %v1389_v57 = vpop.f32.mrf.mxu1 }
 0x2c6   : > { %v992_v58 = vmax.f32 %v949_v56, 0.0  ;;  %v1390_v59 = vadd.f32 %v1389_v57, %v1388_v49 }
 0x2c7   : > { %v1391_v61 = vpop.f32.mrf.mxu1 }
 0x2c8   : > { %v1027_v62 = vsel %vm1990_vm0, %v949_v56, %v992_v58  ;;  %v952_v63 = vadd.f32 %v1390_v59, %v1986_v34 }
 0x2c9   : > { %1059 = vst [vmem:[#allocation2 + $0xa0] sm:$0xff] %v1027_v62  ;;  %v1392_v2 = vpop.f32.mrf.mxu1 }
 0x2ca   : > { %v993_v5 = vmax.f32 %v952_v63, 0.0  ;;  %v1393_v7 = vadd.f32 %v1392_v2, %v1391_v61 }
 0x2cb   : > { %v1394_v8 = vpop.f32.mrf.mxu1 }
 0x2cc   : > { %v1028_v9 = vsel %vm1990_vm0, %v952_v63, %v993_v5  ;;  %v957_v10 = vadd.f32 %v1393_v7, %v1986_v34 }
 0x2cd   : > { %1060 = vst [vmem:[#allocation2 + $0xf8] sm:$0xff] %v1028_v9  ;;  %v1395_v12 = vpop.f32.mrf.mxu1 }
 0x2ce   : > { %v994_v17 = vmax.f32 %v957_v10, 0.0  ;;  %v1396_v18 = vadd.f32 %v1395_v12, %v1394_v8 }
 0x2d0   : > { %v1029_v19 = vsel %vm1990_vm0, %v957_v10, %v994_v17  ;;  %v960_v21 = vadd.f32 %v1396_v18, %v1986_v34 }
 0x2d1   : > { %1061 = vst [vmem:[#allocation2 + $0x20] sm:$0xff] %v1029_v19  ;;  %1065 = sbr.rel (%p1231_p2) target bundleno = 742 (0x2e6), region = 56 }
 0x2d2   : > { %v995_v22 = vmax.f32 %v960_v21, 0.0 }
 0x2d4   : > { %v1030_v24 = vsel %vm1990_vm0, %v960_v21, %v995_v22 }
 0x2d5   : > { %1062 = vst [vmem:[#allocation2 + $0x98] sm:$0xff] %v1030_v24 }
 0x2d6   : > { %1066 = vst [vmem:[#allocation9] sm:$0xff] %v2001_v55  ;;  %1067 = vst [vmem:[#allocation9 + $0x8] sm:$0xff] %v2013_v3 }
 0x2d7   : > { %1068 = vst [vmem:[#allocation9 + $0x10] sm:$0xff] %v2025_v15  ;;  %1069 = vst [vmem:[#allocation9 + $0x18] sm:$0xff] %v2037_v27 }
 0x2d8   : > { %1070 = vst [vmem:[#allocation9 + $0x20] sm:$0xff] %v2049_v40  ;;  %1071 = vst [vmem:[#allocation9 + $0x28] sm:$0xff] %v2061_v54 }
 0x2d9   : > { %1072 = vst [vmem:[#allocation9 + $0x30] sm:$0xff] %v2073_v4  ;;  %1073 = vst [vmem:[#allocation9 + $0x38] sm:$0xff] %v2085_v14 }
 0x2da   : > { %1074 = vst [vmem:[#allocation9 + $0x40] sm:$0xff] %v1996_v53  ;;  %1075 = vst [vmem:[#allocation9 + $0x48] sm:$0xff] %v2008_v1 }
 0x2db   : > { %1076 = vst [vmem:[#allocation9 + $0x50] sm:$0xff] %v2020_v13  ;;  %1077 = vst [vmem:[#allocation9 + $0x58] sm:$0xff] %v2032_v25 }
 0x2dc   : > { %1078 = vst [vmem:[#allocation9 + $0x60] sm:$0xff] %v2044_v38  ;;  %1079 = vst [vmem:[#allocation9 + $0x68] sm:$0xff] %v2056_v51 }
 0x2dd   : > { %1080 = vst [vmem:[#allocation9 + $0x70] sm:$0xff] %v2068_v0  ;;  %1081 = vst [vmem:[#allocation9 + $0x78] sm:$0xff] %v2080_v11 }
 0x2de   : > { %1082 = vst [vmem:[#allocation9 + $0x80] sm:$0xff] %v2091_v20  ;;  %1083 = vst [vmem:[#allocation9 + $0x88] sm:$0xff] %v2097_v28 }
 0x2df   : > { %1084 = vst [vmem:[#allocation9 + $0x90] sm:$0xff] %v2103_v35  ;;  %1085 = vst [vmem:[#allocation9 + $0x98] sm:$0xff] %v2109_v43 }
 0x2e0   : > { %1086 = vst [vmem:[#allocation9 + $0xa0] sm:$0xff] %v2115_v50  ;;  %1087 = vst [vmem:[#allocation9 + $0xa8] sm:$0xff] %v2121_v60 }
 0x2e1   : > { %1088 = vst [vmem:[#allocation9 + $0xb0] sm:$0xff] %v2127_v6  ;;  %1089 = vst [vmem:[#allocation9 + $0xb8] sm:$0xff] %v2133_v16 }
 0x2e2   : > { %1090 = vst [vmem:[#allocation9 + $0xc0] sm:$0xff] %v2139_v23  ;;  %1091 = vst [vmem:[#allocation9 + $0xc8] sm:$0xff] %v2145_v32 }
 0x2e3   : > { %1092 = vst [vmem:[#allocation9 + $0xd0] sm:$0xff] %v1025_v42  ;;  %1093 = vst [vmem:[#allocation9 + $0xd8] sm:$0xff] %v1026_v52 }
 0x2e4   : > { %1094 = vst [vmem:[#allocation9 + $0xe0] sm:$0xff] %v1027_v62  ;;  %1095 = vst [vmem:[#allocation9 + $0xe8] sm:$0xff] %v1028_v9 }
 0x2e5   : > { %1096 = vst [vmem:[#allocation9 + $0xf0] sm:$0xff] %v1029_v19  ;;  %1097 = vst [vmem:[#allocation9 + $0xf8] sm:$0xff] %v1030_v24 }
 0x2e6 PF: > { %s1769_s18 = smov [#allocation9]  }
 0x2e7   : > { %s1104_s11 = sshll.u32 %s1769_s18, 4  ;;  %s1105_s11 = int_to_ptr.vmem [resolvable:$true] %s1104_s11 }
 0x2e8   : > { %s1692_s13 = scalar_lea.vmem %s1105_s11, 4096  ;;  %p1699_p7 = scmp.lt.s32.totalorder %s1105_s11, %s1105_s11 }
 0x2e9   : > { %p1693_p3 = scmp.ne.s32.totalorder %s1105_s11, %s1692_s13  ;;  %p1700_p12 = scmp.lt.s32.totalorder %s1692_s13, %s1692_s13 }
 0x2eb   : > { %p1694_p6 = pnand %p1693_p3, %p963_p13  ;;  %p1701_p11 = por %p1700_p12, %p1699_p7 }
 0x2ed   : > { %p1695_p1 = pneg %p1694_p6 }
 0x2ef   : > { %p1702_p4 = pnand %p1701_p11, %p1695_p1 }
 0x2f1   : > { %1705 = shalt.err (!%p1702_p4)
}
 0x2f2   : > { %s1770_s14 = smov 128   ;;  %s1771_s15 = smov 8  }
 0x2f3   : > { %1504 = dma.vmem_to_hbm [thread:$0]  (%p963_p13), %s1105_s11, 4096, %s2221_s4, [#allocation5], %s1770_s14, %s1770_s14, %s1771_s15  }
 0x2f4   : > { %1745 = dma.done.wait (%p963_p13), [#allocation5], 4096  }
 0x2f5   : > { %1747 = vsyncadd (%p963_p13), [#allocation5], 4294963200 }
 0x2f6 PF: > { %p14_p8 = scmp.ge.s32.totalorder %s1819_s20, 5   ;;  %s2239_s15 = smov %s1754_s16 }
 0x2f7   : > { %s2240_s16 = smov %s1758_s17  ;;  %s2241_s17 = smov %s1829_s23 }
 0x2f8   : > { %s2242_s18 = smov %s1819_s20  ;;  %16 = sbr.rel (!%p14_p8) target bundleno = 4 (0x4), region = 91 }
 0x2fd   :  { %1120 = vsyncpa [#allocation4], 1 }
 0x2fe   :  { %1122 = vsyncpa [#allocation4 + $0x1], 1 }
 0x2ff   :  { %1123 = vsyncpa [#allocation7], 1 }
 0x300   :  { %1124 = vsyncpa [#allocation5], 1 }
 0x301   :  { %1126 = vsyncpa [#allocation5 + $0x1], 1 }

</bundles_post_ra>
